<compile_context>
chip_gen: v7x
topology: tpu7x:2x2x1
jax: 0.10.0
libtpu: 0.0.40
codegen_flags: <defaults>
</compile_context>

<pallas_src>
import numpy as np

import jax
import jax.numpy as jnp
from jax.experimental import pallas as pl
from jax.experimental.pallas import tpu as pltpu

LANES = 128  # TPU lane width; num_losses is padded up to this


# ----------------------------------------------------------------------------
# Kernel: one (2, 128) f32 block in VMEM -> scalar in SMEM.
#   row 0 = losses, row 1 = s (both zero padded past num_losses).
# Padded lanes contribute 0*exp(0)+0 = 0, so no mask is needed.
# ----------------------------------------------------------------------------
def _exp_weight_kernel(x_ref, out_ref):
    losses = x_ref[0:1, :]                          # (1, LANES)  VPU
    s = x_ref[1:2, :]                               # (1, LANES)
    # exp -> EUP slot, mul/add -> VALU, lane reduce -> XLU, scalar store -> SMEM.
    out_ref[0, 0] = jnp.sum(losses * jnp.exp(-s) + s)


def _exp_weight_pallas(packed: jax.Array) -> jax.Array:
    out = pl.pallas_call(
        _exp_weight_kernel,
        out_shape=jax.ShapeDtypeStruct((1, 1), jnp.float32),
        in_specs=[pl.BlockSpec(memory_space=pltpu.MemorySpace.VMEM)],
        out_specs=pl.BlockSpec(memory_space=pltpu.MemorySpace.SMEM),
        # Tell XLA this custom call is near-free so it doesn't serialize the
        # surrounding training graph around it.
        cost_estimate=pl.CostEstimate(
            flops=3 * LANES,
            transcendentals=LANES,
            bytes_accessed=2 * LANES * 4 + 4,
        ),
    )(packed)
    return out[0, 0]


# ----------------------------------------------------------------------------
# custom_vjp so the module is usable under jax.grad (Pallas calls are not
# auto-differentiated on TPU). Backward is plain fused jnp — no kernel needed.
#   d/dloss_i = exp(-s_i)          d/ds_i = 1 - loss_i * exp(-s_i)
# ----------------------------------------------------------------------------
@jax.custom_vjp
def _exp_weight(packed: jax.Array) -> jax.Array:
    return _exp_weight_pallas(packed)


def _exp_weight_fwd(packed):
    e = jnp.exp(-packed[1, :])
    return _exp_weight_pallas(packed), (packed[0, :], e)


def _exp_weight_bwd(res, g):
    losses, e = res
    grad_packed = jnp.stack([e, 1.0 - losses * e]) * g
    # Padded-lane cotangents are discarded by the pad adjoint (a slice).
    return (grad_packed,)


_exp_weight.defvjp(_exp_weight_fwd, _exp_weight_bwd)


@jax.jit
def _forward_pallas(losses: jax.Array, s_param: jax.Array) -> jax.Array:
    n = losses.shape[0]
    packed = jnp.stack([losses.astype(jnp.float32), s_param.astype(jnp.float32)])
    packed = jnp.pad(packed, ((0, 0), (0, LANES - n)))  # one fused pad, no scatters
    return _exp_weight(packed)


@jax.jit
def _forward_inline(losses: jax.Array, s_param: jax.Array) -> jax.Array:
    # Recommended production hot path: lets XLA fuse the reduction into
    # neighboring ops at essentially zero marginal cost (no custom-call
    # boundary, no DMA).
    s = s_param.astype(jnp.float32)
    return jnp.sum(losses.astype(jnp.float32) * jnp.exp(-s) + s)


# ----------------------------------------------------------------------------
# Module wrapper (mirrors the PyTorch ExponentialWeights forward).
# ----------------------------------------------------------------------------
class ExponentialWeights:
    """JAX/Pallas port of the PyTorch ExponentialWeights module."""

    def __init__(self, num_losses: int, init_weights: list, use_pallas: bool = True):
        assert len(init_weights) == num_losses
        assert num_losses <= LANES, f"num_losses must be <= {LANES}"
        self.num_losses = num_losses
        self.use_pallas = use_pallas
        # Learnable s_param in the original module (kept f32 on all chips).
        self.s_param = jnp.asarray(init_weights, dtype=jnp.float32)

    def _coerce_losses(self, list_losses) -> jax.Array:
        if isinstance(list_losses, (list, tuple)):
            assert len(list_losses) == self.num_losses
            if all(not isinstance(l, jax.Array) for l in list_losses):
                # Host scalars: one numpy conversion, one H2D transfer.
                return jnp.asarray(np.asarray(list_losses, np.float32))
            # Device scalars: one stack op inside the trace.
            return jnp.stack(list(list_losses)).astype(jnp.float32).reshape(
                self.num_losses
            )
        losses = jnp.asarray(list_losses, jnp.float32)
        assert losses.shape == (self.num_losses,)
        return losses

    def __call__(self, list_losses):
        losses = self._coerce_losses(list_losses)
        fwd = _forward_pallas if self.use_pallas else _forward_inline
        total_loss = fwd(losses, self.s_param)
        # Mirrors s_param.detach() in the torch code; returned as a single
        # array (index it if per-loss scalars are needed) to avoid n tiny
        # gather dispatches per training step.
        s_detached = jax.lax.stop_gradient(self.s_param)
        return total_loss, s_detached


if __name__ == "__main__":
    key = jax.random.PRNGKey(0)
    num_losses = 4
    init_weights = [0.0, 0.5, -0.25, 1.0]

    module = ExponentialWeights(num_losses, init_weights, use_pallas=True)

    # Small synthetic per-loss scalars (e.g. individual training losses).
    loss_vals = jax.random.uniform(key, (num_losses,), dtype=jnp.float32) * 2.0

    # Pallas path: stacked vector input (single dispatch).
    total_loss, s_detached = module(loss_vals)
    total_loss = jax.block_until_ready(total_loss)

    # Reference check in plain JAX.
    s = jnp.asarray(init_weights, jnp.float32)
    ref = jnp.sum(loss_vals * jnp.exp(-s) + s)
    assert jnp.allclose(total_loss, ref, rtol=1e-5, atol=1e-5), (total_loss, ref)
    assert s_detached.shape == (num_losses,)

    # Inline (pure-XLA) path agrees with the Pallas path.
    inline_loss = jax.block_until_ready(_forward_inline(loss_vals, module.s_param))
    assert jnp.allclose(inline_loss, ref, rtol=1e-5, atol=1e-5), (inline_loss, ref)

    # List-of-scalars path (torch-style API): host floats, one H2D transfer.
    host_losses = [float(v) for v in np.asarray(loss_vals)]
    total_loss_list, _ = module(host_losses)
    assert jnp.allclose(
        jax.block_until_ready(total_loss_list), ref, rtol=1e-5, atol=1e-5
    )

    # Gradient check through the custom_vjp (training usability).
    g_losses, g_s = jax.grad(lambda l, sp: _forward_pallas(l, sp), argnums=(0, 1))(
        loss_vals, module.s_param
    )
    g_losses = jax.block_until_ready(g_losses)
    assert jnp.allclose(g_losses, jnp.exp(-s), rtol=1e-5, atol=1e-5), (g_losses,)
    assert jnp.allclose(g_s, 1.0 - loss_vals * jnp.exp(-s), rtol=1e-5, atol=1e-5), (g_s,)

    print("KERNEL_OK")
</pallas_src>

<mosaic_0001>
module attributes {stable_mosaic.version = 11 : i64} {
  func.func @_exp_weight_kernel(%arg0: memref<2x128xf32, #tpu.memory_space<vmem>>, %arg1: memref<1x1xf32, #tpu.memory_space<smem>>) attributes {dimension_semantics = [], scalar_prefetch = 0 : i64, scratch_operands = 0 : i64, tpu.core_type = #tpu.core_type<tc>} {
    %c0 = arith.constant 0 : index
    %c0_0 = arith.constant 0 : index
    %0 = vector.load %arg0[%c0, %c0_0] : memref<2x128xf32, #tpu.memory_space<vmem>>, vector<1x128xf32>
    %c1 = arith.constant 1 : index
    %c0_1 = arith.constant 0 : index
    %1 = vector.load %arg0[%c1, %c0_1] : memref<2x128xf32, #tpu.memory_space<vmem>>, vector<1x128xf32>
    %cst = arith.constant 0.000000e+00 : f32
    %2 = vector.broadcast %cst : f32 to vector<1x128xf32>
    %3 = arith.subf %2, %1 : vector<1x128xf32>
    %4 = math.exp %3 : vector<1x128xf32>
    %5 = arith.mulf %0, %4 : vector<1x128xf32>
    %6 = arith.addf %5, %1 : vector<1x128xf32>
    %7 = vector.shape_cast %6 : vector<1x128xf32> to vector<1x1x128xf32>
    %cst_2 = arith.constant dense<0.000000e+00> : vector<1xf32>
    %8 = vector.multi_reduction <add>, %7, %cst_2 [1, 2] : vector<1x1x128xf32> to vector<1xf32>
    %9 = vector.shape_cast %8 : vector<1xf32> to vector<1x1x1xf32>
    %10 = vector.extract %9[0, 0, 0] : f32 from vector<1x1x1xf32>
    %c0_3 = arith.constant 0 : index
    %c0_4 = arith.constant 0 : index
    %11 = memref.load %arg1[%c0_3, %c0_4] : memref<1x1xf32, #tpu.memory_space<smem>>
    memref.store %10, %arg1[%c0_3, %c0_4] : memref<1x1xf32, #tpu.memory_space<smem>>
    return
  }
}

</mosaic_0001>

<bundles_post_ra>
// kernel: _forward_pallas.1
= control target key start
LH: loop header
LB: loop body
LE: loop exit
PB: predicated region body
PF: predicated region fallthrough
CT: control target
= control target key end

     0   :  { %s88_s0 = inlined_call_operand.vmem [shape: f32[2,128], index: 0, kind: input, shape index: {}]   ;;  %s89_s1 = inlined_call_operand.hbm [shape: f32[1,1], index: 1, kind: output, shape index: {}]  }
   0x1   :  { %v10_v0 = vld [vmem:[%s88_s0 + $0x1] sm:$0x1] }
   0x2   :  { %v11_v1 = vsub.f32 0.0, %v10_v0 }
   0x3   :  { %6 = vsyncpa [#allocation3], 0  ;;  %v9_v3 = vld [vmem:[%s88_s0] sm:$0x1]  ;;  %vm16_vm0 = vcmask 1040384   ;;  %s47_s0 = scalar_lea.hbm %s89_s1, 16 }
   0x4   :  { %v12_v2 = vmul.f32 1.442695, %v11_v1  ;;  %p48_p0 = scmp.ne.s32.totalorder %s89_s1, %s47_s0  ;;  %p51_p1 = scmp.lt.u32.totalorder %s47_s0, %s89_s1 }
   0x6   :  { %45 = vpow2.f32 %v12_v2  ;;  %p53_p2 = pnand %p51_p1, %p48_p0 }
  0x10   :  { %v46_v4 = vpop.eup %45 }
  0x11   :  { %v14_v5 = vmul.f32 %v46_v4, %v9_v3 }
  0x13   :  { %v15_v6 = vadd.f32 %v14_v5, %v10_v0 }
  0x15   :  { %v17_v7 = vsel %vm16_vm0, %v15_v6, 0.0 }
  0x16   :  { %18 = vadd.xlane.f32.xlu0 %v17_v7 }
  0xa3   :  { %v19_v8 = vpop.xlane.xlu0 %18 }
  0xa4   :  { %v20_v9 = vrot.slane %v19_v8, 4 }
  0xa6   :  { %v21_v10 = vadd.f32 %v20_v9, %v19_v8 }
  0xa8   :  { %v22_v11 = vrot.slane %v21_v10, 2 }
  0xaa   :  { %v23_v12 = vadd.f32 %v22_v11, %v21_v10 }
  0xac   :  { %v24_v13 = vrot.slane %v23_v12, 1 }
  0xae   :  { %v25_v14 = vadd.f32 %v24_v13, %v23_v12 }
  0xb0   :  { %42 = vpush %v25_v14 }
  0xe1   :  { %s43_s10 = spop %42 }
  0xe2   :  { %28 = sst [smem:[#allocation2]] %s43_s10 }
  0xe3   :  { %56 = shalt.err (!%p53_p2)
}
  0xe4   :  { %s59_s17 = smov [#allocation2]  }
  0xe5   :  { %36 = dma.smem_to_hbm %s59_s17, 16, %s89_s1, [#allocation3]  }
  0xe6   :  { %57 = dma.done.wait [#allocation3], 16  }
  0xe7   :  { %58 = vsyncadd [#allocation3], 4294967280 }
  0xe8   :  { %40 = sfence }
  0xe9   :  { %41 = vsyncpa [#allocation3], 1 }

</bundles_post_ra>
